<compile_context>
chip_gen: v7x
topology: tpu7x:2x2x1
jax: 0.10.0
libtpu: 0.0.40
codegen_flags: <defaults>
</compile_context>

<pallas_src>
import functools

import jax
import jax.numpy as jnp
from jax.experimental import pallas as pl
from jax.experimental.pallas import tpu as pltpu


# ----------------------------- config (small, synthetic) --------------------
DOWNSAMPLE = 2
VISION_HIDDEN = 32
TEXT_HIDDEN = 64
ALIGN_INTERMEDIATE = 128            # alignment_intermediate_size
LN_EPS = 1e-6                       # adapter_layer_norm_eps

D_IN = VISION_HIDDEN * DOWNSAMPLE ** 2      # 128 = layernorm / linear_1 input dim
HALF = ALIGN_INTERMEDIATE // 2              # 64  = linear_2 input dim


def _round_up(x, m):
    return (x + m - 1) // m * m


# ----------------------------- Pallas kernel --------------------------------
def projector_kernel(x_ref, lnw_ref, lnb_ref,
                     w1x_ref, b1x_ref, w1g_ref, b1g_ref,
                     w2_ref, b2_ref, o_ref, *, eps):
    # x_ref: (TM, D_IN) tile of tokens.
    x = x_ref[...].astype(jnp.float32)

    # LayerNorm over feature axis (biased variance, like torch.nn.LayerNorm).
    mean = jnp.mean(x, axis=-1, keepdims=True)
    var = jnp.mean(jnp.square(x - mean), axis=-1, keepdims=True)
    xn = (x - mean) * jax.lax.rsqrt(var + eps)
    xn = xn * lnw_ref[...].astype(jnp.float32) + lnb_ref[...].astype(jnp.float32)

    # MXU operands in the weight dtype (f32 here; bf16 if the model is bf16),
    # always accumulating in f32.
    xn_mxu = xn.astype(w1x_ref.dtype)

    # linear_1, pre-split into the two SwiGLU halves -> no in-kernel lane slice.
    x_half = jnp.dot(xn_mxu, w1x_ref[...],
                     preferred_element_type=jnp.float32) + b1x_ref[...].astype(jnp.float32)
    gate = jnp.dot(xn_mxu, w1g_ref[...],
                   preferred_element_type=jnp.float32) + b1g_ref[...].astype(jnp.float32)

    # SwiGLU: silu(gate) * x  (pure per-lane VPU/EUP math, kept in f32).
    s = (gate * jax.nn.sigmoid(gate)) * x_half

    # linear_2 : (TM, HALF) @ (HALF, OUT) + (1, OUT)
    out = jnp.dot(s.astype(w2_ref.dtype), w2_ref[...],
                  preferred_element_type=jnp.float32) + b2_ref[...].astype(jnp.float32)
    o_ref[...] = out.astype(o_ref.dtype)


# ----------------------------- glue (plain JAX) ------------------------------
def pixel_shuffle(image_features, ds):
    """Exact port of AyaVisionMultiModalProjector.pixel_shuffle."""
    b, s, d = image_features.shape
    h = w = int(s ** 0.5)
    x = image_features.reshape(b, w, h, d)
    x = x.reshape(b, w, h // ds, d * ds)
    x = jnp.transpose(x, (0, 2, 1, 3))           # (b, h/ds, w, d*ds)
    x = x.reshape(b, h // ds, w // ds, d * ds * ds)
    x = jnp.transpose(x, (0, 2, 1, 3))           # (b, w/ds, h/ds, d*ds^2)
    return x


def aya_vision_projector(image_features, params, *, ds=DOWNSAMPLE,
                         eps=LN_EPS, tm=512):
    x = pixel_shuffle(image_features, ds)        # (B, W/ds, H/ds, D_IN)
    b, wd, hd, din = x.shape
    n = b * wd * hd

    # Large token tile (perf), clamped + padded so tiny inputs still work.
    # Zero-padded rows are discarded after the kernel (per-row independence).
    tm_eff = min(tm, _round_up(n, 8))
    n_pad = _round_up(n, tm_eff)
    xf = x.reshape(n, din)
    if n_pad != n:
        xf = jnp.pad(xf, ((0, n_pad - n), (0, 0)))

    lnw = params["ln_w"].reshape(1, din)
    lnb = params["ln_b"].reshape(1, din)
    w1 = params["w1"]                            # (D_IN, I)
    b1 = params["b1"]                            # (I,)
    w2 = params["w2"]                            # (I/2, O)
    b2 = params["b2"].reshape(1, -1)             # (1, O)
    inter = w1.shape[1]
    half = inter // 2
    out_dim = w2.shape[1]

    # Pre-split linear_1 into (x, gate) halves -> SwiGLU needs no lane slice.
    w1x, w1g = w1[:, :half], w1[:, half:]
    b1x, b1g = b1[:half].reshape(1, half), b1[half:].reshape(1, half)

    grid = (n_pad // tm_eff,)

    flops = 2 * n_pad * (din * inter + half * out_dim) + 6 * n_pad * din
    bytes_accessed = (n_pad * (din + out_dim) * xf.dtype.itemsize
                      + (din * inter + half * out_dim + 2 * din + inter + out_dim)
                      * w1.dtype.itemsize)
    cost = pl.CostEstimate(flops=flops,
                           transcendentals=n_pad * half,     # sigmoid
                           bytes_accessed=bytes_accessed)

    out = pl.pallas_call(
        functools.partial(projector_kernel, eps=eps),
        out_shape=jax.ShapeDtypeStruct((n_pad, out_dim), image_features.dtype),
        grid_spec=pltpu.PrefetchScalarGridSpec(
            num_scalar_prefetch=0,
            grid=grid,
            in_specs=[
                pl.BlockSpec((tm_eff, din), lambda i: (i, 0)),   # token tile
                pl.BlockSpec((1, din), lambda i: (0, 0)),        # ln weight
                pl.BlockSpec((1, din), lambda i: (0, 0)),        # ln bias
                pl.BlockSpec((din, half), lambda i: (0, 0)),     # W1 (x half)
                pl.BlockSpec((1, half), lambda i: (0, 0)),       # b1 (x half)
                pl.BlockSpec((din, half), lambda i: (0, 0)),     # W1 (gate half)
                pl.BlockSpec((1, half), lambda i: (0, 0)),       # b1 (gate half)
                pl.BlockSpec((half, out_dim), lambda i: (0, 0)), # W2
                pl.BlockSpec((1, out_dim), lambda i: (0, 0)),    # b2
            ],
            out_specs=pl.BlockSpec((tm_eff, out_dim), lambda i: (i, 0)),
        ),
        compiler_params=pltpu.CompilerParams(
            dimension_semantics=("parallel",)),
        cost_estimate=cost,
    )(xf, lnw, lnb, w1x, b1x, w1g, b1g, w2, b2)

    out = out[:n]
    return out.reshape(b, wd, hd, out_dim)


# ----------------------------- reference (pure JAX) --------------------------
def reference_projector(image_features, params, *, ds=DOWNSAMPLE, eps=LN_EPS):
    x = pixel_shuffle(image_features, ds).astype(jnp.float32)
    mean = jnp.mean(x, axis=-1, keepdims=True)
    var = jnp.mean(jnp.square(x - mean), axis=-1, keepdims=True)
    xn = (x - mean) / jnp.sqrt(var + eps)
    xn = xn * params["ln_w"] + params["ln_b"]
    h = xn @ params["w1"] + params["b1"]
    half = h.shape[-1] // 2
    xh, gate = h[..., :half], h[..., half:]
    s = jax.nn.silu(gate) * xh
    return s @ params["w2"] + params["b2"]


# ----------------------------- main ------------------------------------------
if __name__ == "__main__":
    key = jax.random.PRNGKey(0)
    k_x, k_w1, k_b1, k_w2, k_b2 = jax.random.split(key, 5)

    B, S = 2, 64                                  # seq = 8x8 patches
    image_features = jax.random.normal(k_x, (B, S, VISION_HIDDEN), jnp.float32)

    # Deterministic synthetic parameters (torch-LayerNorm default: w=1, b=0).
    params = {
        "ln_w": jnp.ones((D_IN,), jnp.float32),
        "ln_b": jnp.zeros((D_IN,), jnp.float32),
        "w1": jax.random.normal(k_w1, (D_IN, ALIGN_INTERMEDIATE), jnp.float32) * 0.05,
        "b1": jax.random.normal(k_b1, (ALIGN_INTERMEDIATE,), jnp.float32) * 0.05,
        "w2": jax.random.normal(k_w2, (HALF, TEXT_HIDDEN), jnp.float32) * 0.05,
        "b2": jax.random.normal(k_b2, (TEXT_HIDDEN,), jnp.float32) * 0.05,
    }

    fwd = jax.jit(functools.partial(aya_vision_projector, tm=512))
    out = jax.block_until_ready(fwd(image_features, params))

    ref = reference_projector(image_features, params)
    expected_shape = (B, 8 // DOWNSAMPLE, 8 // DOWNSAMPLE, TEXT_HIDDEN)
    assert out.shape == expected_shape, (out.shape, expected_shape)
    assert out.shape == ref.shape, (out.shape, ref.shape)
    assert jnp.allclose(out, ref, atol=1e-4, rtol=1e-4), \
        float(jnp.max(jnp.abs(out - ref)))

    print("KERNEL_OK")
</pallas_src>

<mosaic_0001>
module attributes {stable_mosaic.version = 11 : i64} {
  func.func @projector_kernel(%arg0: i32, %arg1: memref<32x128xf32, #tpu.memory_space<vmem>>, %arg2: memref<1x128xf32, #tpu.memory_space<vmem>>, %arg3: memref<1x128xf32, #tpu.memory_space<vmem>>, %arg4: memref<128x64xf32, #tpu.memory_space<vmem>>, %arg5: memref<1x64xf32, #tpu.memory_space<vmem>>, %arg6: memref<128x64xf32, #tpu.memory_space<vmem>>, %arg7: memref<1x64xf32, #tpu.memory_space<vmem>>, %arg8: memref<64x64xf32, #tpu.memory_space<vmem>>, %arg9: memref<1x64xf32, #tpu.memory_space<vmem>>, %arg10: memref<32x64xf32, #tpu.memory_space<vmem>>) attributes {dimension_semantics = [#tpu.dimension_semantics<parallel>], iteration_bounds = array<i64: 1>, scalar_prefetch = 0 : i64, scratch_operands = 0 : i64, tpu.core_type = #tpu.core_type<tc>, window_params = [{transform_indices = @transform_0, window_bounds = array<i64: 32, 128>}, {pipeline_mode = #tpu.pipeline_mode<synchronous>, transform_indices = @transform_1, window_bounds = array<i64: 1, 128>}, {pipeline_mode = #tpu.pipeline_mode<synchronous>, transform_indices = @transform_2, window_bounds = array<i64: 1, 128>}, {pipeline_mode = #tpu.pipeline_mode<synchronous>, transform_indices = @transform_3, window_bounds = array<i64: 128, 64>}, {pipeline_mode = #tpu.pipeline_mode<synchronous>, transform_indices = @transform_4, window_bounds = array<i64: 1, 64>}, {pipeline_mode = #tpu.pipeline_mode<synchronous>, transform_indices = @transform_5, window_bounds = array<i64: 128, 64>}, {pipeline_mode = #tpu.pipeline_mode<synchronous>, transform_indices = @transform_6, window_bounds = array<i64: 1, 64>}, {pipeline_mode = #tpu.pipeline_mode<synchronous>, transform_indices = @transform_7, window_bounds = array<i64: 64, 64>}, {pipeline_mode = #tpu.pipeline_mode<synchronous>, transform_indices = @transform_8, window_bounds = array<i64: 1, 64>}, {transform_indices = @transform_9, window_bounds = array<i64: 32, 64>}]} {
    %c0 = arith.constant 0 : index
    %c0_0 = arith.constant 0 : index
    %0 = vector.load %arg1[%c0, %c0_0] : memref<32x128xf32, #tpu.memory_space<vmem>>, vector<32x128xf32>
    %cst = arith.constant dense<0.000000e+00> : vector<32xf32>
    %1 = vector.multi_reduction <add>, %0, %cst [1] : vector<32x128xf32> to vector<32xf32>
    %2 = vector.shape_cast %1 : vector<32xf32> to vector<32x1xf32>
    %cst_1 = arith.constant 1.280000e+02 : f32
    %3 = vector.broadcast %cst_1 : f32 to vector<32x1xf32>
    %4 = arith.divf %2, %3 : vector<32x1xf32>
    %5 = vector.broadcast %4 : vector<32x1xf32> to vector<32x128xf32>
    %6 = arith.subf %0, %5 : vector<32x128xf32>
    %7 = arith.mulf %6, %6 : vector<32x128xf32>
    %cst_2 = arith.constant dense<0.000000e+00> : vector<32xf32>
    %8 = vector.multi_reduction <add>, %7, %cst_2 [1] : vector<32x128xf32> to vector<32xf32>
    %9 = vector.shape_cast %8 : vector<32xf32> to vector<32x1xf32>
    %cst_3 = arith.constant 1.280000e+02 : f32
    %10 = vector.broadcast %cst_3 : f32 to vector<32x1xf32>
    %11 = arith.divf %9, %10 : vector<32x1xf32>
    %12 = vector.broadcast %4 : vector<32x1xf32> to vector<32x128xf32>
    %13 = arith.subf %0, %12 : vector<32x128xf32>
    %cst_4 = arith.constant 9.99999997E-7 : f32
    %14 = vector.broadcast %cst_4 : f32 to vector<32x1xf32>
    %15 = arith.addf %11, %14 : vector<32x1xf32>
    %16 = math.rsqrt %15 : vector<32x1xf32>
    %17 = vector.broadcast %16 : vector<32x1xf32> to vector<32x128xf32>
    %18 = arith.mulf %13, %17 : vector<32x128xf32>
    %c0_5 = arith.constant 0 : index
    %c0_6 = arith.constant 0 : index
    %19 = vector.load %arg2[%c0_5, %c0_6] : memref<1x128xf32, #tpu.memory_space<vmem>>, vector<1x128xf32>
    %20 = vector.broadcast %19 : vector<1x128xf32> to vector<32x128xf32>
    %21 = arith.mulf %18, %20 : vector<32x128xf32>
    %c0_7 = arith.constant 0 : index
    %c0_8 = arith.constant 0 : index
    %22 = vector.load %arg3[%c0_7, %c0_8] : memref<1x128xf32, #tpu.memory_space<vmem>>, vector<1x128xf32>
    %23 = vector.broadcast %22 : vector<1x128xf32> to vector<32x128xf32>
    %24 = arith.addf %21, %23 : vector<32x128xf32>
    %c0_9 = arith.constant 0 : index
    %c0_10 = arith.constant 0 : index
    %25 = vector.load %arg4[%c0_9, %c0_10] : memref<128x64xf32, #tpu.memory_space<vmem>>, vector<128x64xf32>
    %cst_11 = arith.constant dense<0.000000e+00> : vector<32x64xf32>
    %26 = tpu.matmul %24, %25, %cst_11 {dimension_numbers = #tpu.dot_dimension_numbers<[1], [0], [0], [1], [0, 0, 1, 1], [], []>} : vector<32x128xf32>, vector<128x64xf32>, vector<32x64xf32> -> vector<32x64xf32>
    %c0_12 = arith.constant 0 : index
    %c0_13 = arith.constant 0 : index
    %27 = vector.load %arg5[%c0_12, %c0_13] : memref<1x64xf32, #tpu.memory_space<vmem>>, vector<1x64xf32>
    %28 = vector.broadcast %27 : vector<1x64xf32> to vector<32x64xf32>
    %29 = arith.addf %26, %28 : vector<32x64xf32>
    %c0_14 = arith.constant 0 : index
    %c0_15 = arith.constant 0 : index
    %30 = vector.load %arg6[%c0_14, %c0_15] : memref<128x64xf32, #tpu.memory_space<vmem>>, vector<128x64xf32>
    %cst_16 = arith.constant dense<0.000000e+00> : vector<32x64xf32>
    %31 = tpu.matmul %24, %30, %cst_16 {dimension_numbers = #tpu.dot_dimension_numbers<[1], [0], [0], [1], [0, 0, 1, 1], [], []>} : vector<32x128xf32>, vector<128x64xf32>, vector<32x64xf32> -> vector<32x64xf32>
    %c0_17 = arith.constant 0 : index
    %c0_18 = arith.constant 0 : index
    %32 = vector.load %arg7[%c0_17, %c0_18] : memref<1x64xf32, #tpu.memory_space<vmem>>, vector<1x64xf32>
    %33 = vector.broadcast %32 : vector<1x64xf32> to vector<32x64xf32>
    %34 = arith.addf %31, %33 : vector<32x64xf32>
    %35 = arith.negf %34 : vector<32x64xf32>
    %36 = math.exp %35 : vector<32x64xf32>
    %cst_19 = arith.constant 1.000000e+00 : f32
    %37 = vector.broadcast %cst_19 : f32 to vector<32x64xf32>
    %38 = arith.addf %37, %36 : vector<32x64xf32>
    %39 = arith.divf %37, %38 : vector<32x64xf32>
    %40 = arith.mulf %34, %39 : vector<32x64xf32>
    %41 = arith.mulf %40, %29 : vector<32x64xf32>
    %c0_20 = arith.constant 0 : index
    %c0_21 = arith.constant 0 : index
    %42 = vector.load %arg8[%c0_20, %c0_21] : memref<64x64xf32, #tpu.memory_space<vmem>>, vector<64x64xf32>
    %cst_22 = arith.constant dense<0.000000e+00> : vector<32x64xf32>
    %43 = tpu.matmul %41, %42, %cst_22 {dimension_numbers = #tpu.dot_dimension_numbers<[1], [0], [0], [1], [0, 0, 1, 1], [], []>} : vector<32x64xf32>, vector<64x64xf32>, vector<32x64xf32> -> vector<32x64xf32>
    %c0_23 = arith.constant 0 : index
    %c0_24 = arith.constant 0 : index
    %44 = vector.load %arg9[%c0_23, %c0_24] : memref<1x64xf32, #tpu.memory_space<vmem>>, vector<1x64xf32>
    %45 = vector.broadcast %44 : vector<1x64xf32> to vector<32x64xf32>
    %46 = arith.addf %43, %45 : vector<32x64xf32>
    %c0_25 = arith.constant 0 : index
    %c0_26 = arith.constant 0 : index
    %47 = vector.load %arg10[%c0_25, %c0_26] : memref<32x64xf32, #tpu.memory_space<vmem>>, vector<32x64xf32>
    tpu.vector_store %arg10[%c0_25, %c0_26], %46 {strides = array<i32>} : memref<32x64xf32, #tpu.memory_space<vmem>>, vector<32x64xf32>,
    return
  }
  func.func @transform_0(%arg0: i32) -> (i32, i32) {
    %c0_i32 = arith.constant 0 : i32
    %c0_i32_0 = arith.constant 0 : i32
    return %arg0, %c0_i32 : i32, i32
  }
  func.func @transform_1(%arg0: i32) -> (i32, i32) {
    %c0_i32 = arith.constant 0 : i32
    %c0_i32_0 = arith.constant 0 : i32
    %c0_i32_1 = arith.constant 0 : i32
    return %c0_i32, %c0_i32_0 : i32, i32
  }
  func.func @transform_2(%arg0: i32) -> (i32, i32) {
    %c0_i32 = arith.constant 0 : i32
    %c0_i32_0 = arith.constant 0 : i32
    %c0_i32_1 = arith.constant 0 : i32
    return %c0_i32, %c0_i32_0 : i32, i32
  }
  func.func @transform_3(%arg0: i32) -> (i32, i32) {
    %c0_i32 = arith.constant 0 : i32
    %c0_i32_0 = arith.constant 0 : i32
    %c0_i32_1 = arith.constant 0 : i32
    return %c0_i32, %c0_i32_0 : i32, i32
  }
  func.func @transform_4(%arg0: i32) -> (i32, i32) {
    %c0_i32 = arith.constant 0 : i32
    %c0_i32_0 = arith.constant 0 : i32
    %c0_i32_1 = arith.constant 0 : i32
    return %c0_i32, %c0_i32_0 : i32, i32
  }
  func.func @transform_5(%arg0: i32) -> (i32, i32) {
    %c0_i32 = arith.constant 0 : i32
    %c0_i32_0 = arith.constant 0 : i32
    %c0_i32_1 = arith.constant 0 : i32
    return %c0_i32, %c0_i32_0 : i32, i32
  }
  func.func @transform_6(%arg0: i32) -> (i32, i32) {
    %c0_i32 = arith.constant 0 : i32
    %c0_i32_0 = arith.constant 0 : i32
    %c0_i32_1 = arith.constant 0 : i32
    return %c0_i32, %c0_i32_0 : i32, i32
  }
  func.func @transform_7(%arg0: i32) -> (i32, i32) {
    %c0_i32 = arith.constant 0 : i32
    %c0_i32_0 = arith.constant 0 : i32
    %c0_i32_1 = arith.constant 0 : i32
    return %c0_i32, %c0_i32_0 : i32, i32
  }
  func.func @transform_8(%arg0: i32) -> (i32, i32) {
    %c0_i32 = arith.constant 0 : i32
    %c0_i32_0 = arith.constant 0 : i32
    %c0_i32_1 = arith.constant 0 : i32
    return %c0_i32, %c0_i32_0 : i32, i32
  }
  func.func @transform_9(%arg0: i32) -> (i32, i32) {
    %c0_i32 = arith.constant 0 : i32
    %c0_i32_0 = arith.constant 0 : i32
    return %arg0, %c0_i32 : i32, i32
  }
}

</mosaic_0001>

<bundles_post_ra>
// kernel: aya_vision_projector.1
= control target key start
LH: loop header
LB: loop body
LE: loop exit
PB: predicated region body
PF: predicated region fallthrough
CT: control target
= control target key end

     0   :  { %s1027_s0 = inlined_call_operand.vmem [shape: f32[32,128], index: 0, kind: input, shape index: {}]   ;;  %s1028_s1 = inlined_call_operand.vmem [shape: f32[1,128], index: 1, kind: input, shape index: {}]   ;;  %s1029_s2 = inlined_call_operand.vmem [shape: f32[1,128], index: 2, kind: input, shape index: {}]   ;;  %s1030_s3 = inlined_call_operand.vmem [shape: f32[128,64], index: 3, kind: input, shape index: {}]   ;;  %s1031_s4 = inlined_call_operand.vmem [shape: f32[1,64], index: 4, kind: input, shape index: {}]   ;;  %s1032_s5 = inlined_call_operand.vmem [shape: f32[128,64], index: 5, kind: input, shape index: {}]   ;;  %s1033_s6 = inlined_call_operand.vmem [shape: f32[1,64], index: 6, kind: input, shape index: {}]   ;;  %s1034_s7 = inlined_call_operand.vmem [shape: f32[64,64], index: 7, kind: input, shape index: {}]   ;;  %s1035_s8 = inlined_call_operand.vmem [shape: f32[1,64], index: 8, kind: input, shape index: {}]   ;;  %s1036_s9 = inlined_call_operand.hbm [shape: f32[32,64], index: 9, kind: output, shape index: {}]  }
   0x1   :  { %v33_v0 = vld [vmem:[%s1027_s0] sm:$0xff]  ;;  %v35_v1 = vld [vmem:[%s1027_s0 + $0x10] sm:$0xff] }
   0x2   :  { %37 = vadd.xlane.f32.xlu0 %v33_v0  ;;  %41 = vadd.xlane.f32.xlu1 %v35_v1 }
   0x3   :  { %14 = vsyncpa [#allocation3], 0  ;;  %v34_v2 = vld [vmem:[%s1027_s0 + $0x8] sm:$0xff]  ;;  %v36_v3 = vld [vmem:[%s1027_s0 + $0x18] sm:$0xff]  ;;  %vm367_vm0 = vcmask 523264   ;;  %s787_s12 = smov [#allocation2]  }
   0x4   :  { %v104_v4 = vld [vmem:[%s1030_s3] sm:$0xff]  ;;  %v105_v5 = vld [vmem:[%s1030_s3 + $0x8] sm:$0xff]  ;;  %v106_v9 = vld [vmem:[%s1030_s3 + $0x10] sm:$0xff]  ;;  %s474_s13 = sshll.u32 %s787_s12, 4  ;;  %s475_s13 = int_to_ptr.vmem [resolvable:$true] %s474_s13 }
   0x5   :  { %v212_v6 = vld [vmem:[%s1032_s5] sm:$0xff]  ;;  %v648_v7 = vpack.c.bf16 %v105_v5, %v104_v4  ;;  %v213_v8 = vld [vmem:[%s1032_s5 + $0x8] sm:$0xff]  ;;  %v107_v10 = vld [vmem:[%s1030_s3 + $0x18] sm:$0xff]  ;;  %p768_p1 = scmp.lt.s32.totalorder %s475_s13, %s475_s13 }
   0x6   :  { %39 = vadd.xlane.f32.xlu0 %v34_v2  ;;  %43 = vadd.xlane.f32.xlu1 %v36_v3  ;;  %v680_v11 = vpack.c.bf16 %v213_v8, %v212_v6  ;;  %v652_v12 = vpack.c.bf16 %v107_v10, %v106_v9  ;;  %v214_v13 = vld [vmem:[%s1032_s5 + $0x10] sm:$0xff]  ;;  %v215_v14 = vld [vmem:[%s1032_s5 + $0x18] sm:$0xff]  ;;  %v108_v32 = vld [vmem:[%s1030_s3 + $0x20] sm:$0xff] }
   0x7   :  { %649 = vmatprep.subr.bf16.mxu0 %v648_v7  ;;  %v684_v15 = vpack.c.bf16 %v215_v14, %v214_v13  ;;  %v109_v33 = vld [vmem:[%s1030_s3 + $0x28] sm:$0xff]  ;;  %v216_v34 = vld [vmem:[%s1032_s5 + $0x20] sm:$0xff]  ;;  %v110_v38 = vld [vmem:[%s1030_s3 + $0x30] sm:$0xff] }
   0x8   :  { %681 = vmatprep.subr.bf16.mxu1 %v680_v11  ;;  %651 = vmatpush3.bf16.msra.mxu0 %v648_v7  ;;  %v656_v35 = vpack.c.bf16 %v109_v33, %v108_v32  ;;  %v217_v36 = vld [vmem:[%s1032_s5 + $0x28] sm:$0xff]  ;;  %v111_v39 = vld [vmem:[%s1030_s3 + $0x38] sm:$0xff]  ;;  %v218_v40 = vld [vmem:[%s1032_s5 + $0x30] sm:$0xff] }
   0x9   :  { %683 = vmatpush3.bf16.msra.mxu1 %v680_v11  ;;  %653 = vmatprep.subr.bf16.mxu0 %v652_v12  ;;  %v688_v37 = vpack.c.bf16 %v217_v36, %v216_v34  ;;  %v660_v41 = vpack.c.bf16 %v111_v39, %v110_v38  ;;  %v219_v42 = vld [vmem:[%s1032_s5 + $0x38] sm:$0xff]  ;;  %v112_v44 = vld [vmem:[%s1030_s3 + $0x40] sm:$0xff]  ;;  %v113_v45 = vld [vmem:[%s1030_s3 + $0x48] sm:$0xff] }
   0xa   :  { %685 = vmatprep.subr.bf16.mxu1 %v684_v15  ;;  %v692_v43 = vpack.c.bf16 %v219_v42, %v218_v40  ;;  %v220_v46 = vld [vmem:[%s1032_s5 + $0x40] sm:$0xff]  ;;  %v664_v47 = vpack.c.bf16 %v113_v45, %v112_v44  ;;  %v221_v48 = vld [vmem:[%s1032_s5 + $0x48] sm:$0xff]  ;;  %v114_v50 = vld [vmem:[%s1030_s3 + $0x50] sm:$0xff] }
   0xb   :  { %v696_v49 = vpack.c.bf16 %v221_v48, %v220_v46  ;;  %v115_v51 = vld [vmem:[%s1030_s3 + $0x58] sm:$0xff]  ;;  %v222_v52 = vld [vmem:[%s1032_s5 + $0x50] sm:$0xff]  ;;  %v116_v55 = vld [vmem:[%s1030_s3 + $0x60] sm:$0xff] }
   0xc   :  { %655 = vmatpush3.bf16.msra.mxu0 %v652_v12  ;;  %v668_v53 = vpack.c.bf16 %v115_v51, %v114_v50  ;;  %v223_v54 = vld [vmem:[%s1032_s5 + $0x58] sm:$0xff]  ;;  %v117_v56 = vld [vmem:[%s1030_s3 + $0x68] sm:$0xff]  ;;  %v224_v59 = vld [vmem:[%s1032_s5 + $0x60] sm:$0xff] }
   0xd   :  { %687 = vmatpush3.bf16.msra.mxu1 %v684_v15  ;;  %657 = vmatprep.subr.bf16.mxu0 %v656_v35  ;;  %v700_v57 = vpack.c.bf16 %v223_v54, %v222_v52  ;;  %v672_v58 = vpack.c.bf16 %v117_v56, %v116_v55  ;;  %v225_v60 = vld [vmem:[%s1032_s5 + $0x68] sm:$0xff]  ;;  %v118_v61 = vld [vmem:[%s1030_s3 + $0x70] sm:$0xff]  ;;  %v119_v63 = vld [vmem:[%s1030_s3 + $0x78] sm:$0xff] }
   0xe   :  { %689 = vmatprep.subr.bf16.mxu1 %v688_v37  ;;  %v704_v62 = vpack.c.bf16 %v225_v60, %v224_v59  ;;  %v355_v38 = vld [vmem:[%s1034_s7 + $0x18] sm:$0xff]  ;;  %v356_v40 = vld [vmem:[%s1034_s7 + $0x20] sm:$0xff] }
   0xf   :  { %v359_v44 = vld [vmem:[%s1034_s7 + $0x38] sm:$0xff]  ;;  %v488_v46 = vld [vmem:[%s1033_s6] ss:$0 sm:$0xff] }
  0x10   :  { %659 = vmatpush3.bf16.msra.mxu0 %v656_v35 }
  0x11   :  { %691 = vmatpush3.bf16.msra.mxu1 %v688_v37  ;;  %661 = vmatprep.subr.bf16.mxu0 %v660_v41 }
  0x12   :  { %693 = vmatprep.subr.bf16.mxu1 %v692_v43 }
  0x14   :  { %663 = vmatpush3.bf16.msra.mxu0 %v660_v41  ;;  %v357_v41 = vld [vmem:[%s1034_s7 + $0x28] sm:$0xff] }
  0x15   :  { %695 = vmatpush3.bf16.msra.mxu1 %v692_v43  ;;  %665 = vmatprep.subr.bf16.mxu0 %v664_v47  ;;  %v720_v42 = vpack.c.bf16 %v357_v41, %v356_v40  ;;  %v358_v43 = vld [vmem:[%s1034_s7 + $0x30] sm:$0xff] }
  0x16   :  { %697 = vmatprep.subr.bf16.mxu1 %v696_v49  ;;  %v724_v45 = vpack.c.bf16 %v359_v44, %v358_v43 }
  0x18   :  { %667 = vmatpush3.bf16.msra.mxu0 %v664_v47 }
  0x19   :  { %699 = vmatpush3.bf16.msra.mxu1 %v696_v49  ;;  %669 = vmatprep.subr.bf16.mxu0 %v668_v53 }
  0x1a   :  { %701 = vmatprep.subr.bf16.mxu1 %v700_v57 }
  0x1c   :  { %671 = vmatpush3.bf16.msra.mxu0 %v668_v53 }
  0x1d   :  { %703 = vmatpush3.bf16.msra.mxu1 %v700_v57  ;;  %673 = vmatprep.subr.bf16.mxu0 %v672_v58 }
  0x1e   :  { %705 = vmatprep.subr.bf16.mxu1 %v704_v62 }
  0x20   :  { %675 = vmatpush3.bf16.msra.mxu0 %v672_v58 }
  0x21   :  { %707 = vmatpush3.bf16.msra.mxu1 %v704_v62 }
  0x8f   :  { %v38_v16 = vpop.xlane.xlu0 %37  ;;  %v42_v17 = vpop.xlane.xlu1 %41 }
  0x90   :  { %v46_v18 = vmul.f32 0.0078125, %v38_v16  ;;  %v48_v19 = vmul.f32 0.0078125, %v42_v17  ;;  %v485_v17 = vld [vmem:[%s1028_s1] ss:$0 sm:$0xff] }
  0x92   :  { %v876_v20 = vsub.f32 %v33_v0, %v46_v18  ;;  %v878_v21 = vsub.f32 %v35_v1, %v48_v19  ;;  %v676_v0 = vpack.c.bf16 %v119_v63, %v118_v61  ;;  %v226_v1 = vld [vmem:[%s1032_s5 + $0x70] sm:$0xff]  ;;  %v486_v19 = vld [vmem:[%s1029_s2] ss:$0 sm:$0xff] }
  0x93   :  { %v40_v22 = vpop.xlane.xlu0 %39  ;;  %v44_v23 = vpop.xlane.xlu1 %43 }
  0x94   :  { %v47_v24 = vmul.f32 0.0078125, %v40_v22  ;;  %v54_v25 = vmul.f32 %v876_v20, %v876_v20  ;;  %v49_v26 = vmul.f32 0.0078125, %v44_v23  ;;  %v56_v29 = vmul.f32 %v878_v21, %v878_v21  ;;  %677 = vmatprep.subr.bf16.mxu0 %v676_v0 }
  0x95   :  { %679 = vmatpush3.bf16.msra.mxu0 %v676_v0 }
  0x96   :  { %v882_v27 = vsub.f32 %v34_v2, %v47_v24  ;;  %58 = vadd.xlane.f32.xlu0 %v54_v25  ;;  %v884_v28 = vsub.f32 %v36_v3, %v49_v26  ;;  %v227_v2 = vld [vmem:[%s1032_s5 + $0x78] sm:$0xff] }
  0x97   :  { %v708_v3 = vpack.c.bf16 %v227_v2, %v226_v1 }
  0x98   :  { %v55_v30 = vmul.f32 %v882_v27, %v882_v27  ;;  %v57_v31 = vmul.f32 %v884_v28, %v884_v28 }
  0x99   :  { %709 = vmatprep.subr.bf16.mxu1 %v708_v3 }
  0x9a   :  { %62 = vadd.xlane.f32.xlu0 %v56_v29  ;;  %60 = vadd.xlane.f32.xlu1 %v55_v30 }
  0x9b   :  { %711 = vmatpush3.bf16.msra.mxu1 %v708_v3 }
  0x9e   :  { %64 = vadd.xlane.f32.xlu1 %v57_v31 }
 0x123   :  { %v59_v4 = vpop.xlane.xlu0 %58 }
 0x124   :  { %v66_v5 = vmul.f32 0.0078125, %v59_v4 }
 0x126   :  { %v70_v6 = vadd.f32 1e-06, %v66_v5 }
 0x127   :  { %v61_v7 = vpop.xlane.xlu1 %60  ;;  %v63_v8 = vpop.xlane.xlu0 %62 }
 0x128   :  { %739 = vrsqrt.f32 %v70_v6  ;;  %v67_v9 = vmul.f32 0.0078125, %v61_v7  ;;  %v68_v10 = vmul.f32 0.0078125, %v63_v8  ;;  %v487_v7 = vld [vmem:[%s1031_s4] ss:$0 sm:$0xff] }
 0x12a   :  { %v71_v11 = vadd.f32 1e-06, %v67_v9  ;;  %v72_v12 = vadd.f32 1e-06, %v68_v10 }
 0x12b   :  { %v65_v13 = vpop.xlane.xlu1 %64 }
 0x12c   :  { %741 = vrsqrt.f32 %v71_v11  ;;  %v69_v14 = vmul.f32 0.0078125, %v65_v13 }
 0x12d   :  { %743 = vrsqrt.f32 %v72_v12 }
 0x12e   :  { %v73_v15 = vadd.f32 1e-06, %v69_v14 }
 0x130   :  { %745 = vrsqrt.f32 %v73_v15 }
 0x132   :  { %v740_v16 = vpop.eup %739 }
 0x133   :  { %v78_v18 = vmul.f32 %v740_v16, %v876_v20 }
 0x135   :  { %v89_v22 = vmul.f32 %v485_v17, %v78_v18 }
 0x136   :  { %v742_v23 = vpop.eup %741 }
 0x137   :  { %v744_v24 = vpop.eup %743  ;;  %v100_v25 = vadd.f32 %v486_v19, %v89_v22  ;;  %v79_v26 = vmul.f32 %v742_v23, %v882_v27  ;;  %v353_v27 = vld [vmem:[%s1034_s7 + $0x8] sm:$0xff] }
 0x138   :  { %v80_v29 = vmul.f32 %v744_v24, %v878_v21  ;;  %v352_v21 = vld [vmem:[%s1034_s7] sm:$0xff] }
 0x139   :  { %582 = vmatprep.mubr.f32.mxu0 %v100_v25  ;;  %620 = vmatprep.mubr.f32.mxu1 %v100_v25  ;;  %v90_v30 = vmul.f32 %v485_v17, %v79_v26  ;;  %v712_v37 = vpack.c.bf16 %v353_v27, %v352_v21  ;;  %v493_v26 = vld [vmem:[%s1035_s8] ss:$0 sm:$0xff]  ;;  %s763_s8 = scalar_lea.vmem %s475_s13, 512 }
 0x13a   :  { %v746_v31 = vpop.eup %745  ;;  %v91_v32 = vmul.f32 %v485_v17, %v80_v29  ;;  %p764_p0 = scmp.ne.s32.totalorder %s475_s13, %s763_s8  ;;  %p769_p2 = scmp.lt.s32.totalorder %s763_s8, %s763_s8 }
 0x13b   :  { %v101_v33 = vadd.f32 %v486_v19, %v90_v30  ;;  %v81_v20 = vmul.f32 %v746_v31, %v884_v28  ;;  %713 = vmatprep.subr.bf16.mxu0 %v712_v37  ;;  %728 = vmatprep.subr.bf16.mxu1 %v712_v37  ;;  %v354_v28 = vld [vmem:[%s1034_s7 + $0x10] sm:$0xff] }
 0x13c   :  { %v102_v34 = vadd.f32 %v486_v19, %v91_v32  ;;  %v716_v39 = vpack.c.bf16 %v355_v38, %v354_v28  ;;  %p770_p3 = por %p769_p2, %p768_p1 }
 0x13d   :  { %583 = vmatmul.mubr.f32.vlgmr.msra.gmra.mrb[0].mxu0 %v101_v33  ;;  %621 = vmatmul.mubr.f32.vlgmr.msra.gmra.mrb[0].mxu1 %v101_v33  ;;  %v92_v35 = vmul.f32 %v485_v17, %v81_v20 }
 0x13e   :  { %585 = vmatprep.mubr.f32.mxu0 %v102_v34  ;;  %623 = vmatprep.mubr.f32.mxu1 %v102_v34  ;;  %p771_p4 = pnand %p770_p3, %p764_p0 }
 0x13f   :  { %v103_v36 = vadd.f32 %v486_v19, %v92_v35  ;;  %715 = vmatpush3.bf16.msra.mxu0 %v712_v37  ;;  %732 = vmatpush3.bf16.msra.mxu1 %v712_v37 }
 0x140   :  { %717 = vmatprep.subr.bf16.mxu0 %v716_v39  ;;  %729 = vmatprep.subr.bf16.mxu1 %v716_v39 }
 0x141   :  { %586 = vmatmul.mubr.f32.gmra.mrb[2].mxu0 %v103_v36  ;;  %624 = vmatmul.mubr.f32.gmra.mrb[2].mxu1 %v103_v36 }
 0x143   :  { %719 = vmatpush3.bf16.msra.mxu0 %v716_v39  ;;  %733 = vmatpush3.bf16.msra.mxu1 %v716_v39 }
 0x144   :  { %721 = vmatprep.subr.bf16.mxu0 %v720_v42  ;;  %730 = vmatprep.subr.bf16.mxu1 %v720_v42 }
 0x147   :  { %723 = vmatpush3.bf16.msra.mxu0 %v720_v42  ;;  %734 = vmatpush3.bf16.msra.mxu1 %v720_v42 }
 0x148   :  { %725 = vmatprep.subr.bf16.mxu0 %v724_v45  ;;  %731 = vmatprep.subr.bf16.mxu1 %v724_v45 }
 0x14b   :  { %727 = vmatpush3.bf16.msra.mxu0 %v724_v45  ;;  %735 = vmatpush3.bf16.msra.mxu1 %v724_v45 }
 0x210   :  { %v584_v47 = vpop.f32.mrb[0].mxu0  ;;  %v622_v48 = vpop.f32.mrb[0].mxu1 }
 0x211   :  { %v307_v49 = vadd.f32 %v622_v48, %v488_v46  ;;  %v193_v50 = vpop.f32.mrb[1].mxu0  ;;  %v301_v51 = vpop.f32.mrb[1].mxu1  ;;  %v199_v10 = vadd.f32 %v584_v47, %v487_v7 }
 0x212   :  { %v302_v52 = vadd.f32 %v488_v46, %v301_v51  ;;  %v194_v12 = vadd.f32 %v487_v7, %v193_v50 }
 0x213   :  { %v490_v53 = vmul.f32 -1.442695, %v307_v49 }
 0x214   :  { %v489_v54 = vmul.f32 -1.442695, %v302_v52  ;;  %v587_v55 = vpop.f32.mrb[2].mxu0  ;;  %v625_v56 = vpop.f32.mrb[2].mxu1 }
 0x215   :  { %747 = vpow2.f32 %v490_v53  ;;  %v317_v57 = vadd.f32 %v625_v56, %v488_v46  ;;  %v203_v58 = vpop.f32.mrb[3].mxu0  ;;  %v311_v59 = vpop.f32.mrb[3].mxu1  ;;  %v209_v18 = vadd.f32 %v587_v55, %v487_v7 }
 0x216   :  { %749 = vpow2.f32 %v489_v54  ;;  %v312_v60 = vadd.f32 %v488_v46, %v311_v59  ;;  %v204_v22 = vadd.f32 %v487_v7, %v203_v58 }
 0x217   :  { %v492_v61 = vmul.f32 -1.442695, %v317_v57 }
 0x218   :  { %v491_v62 = vmul.f32 -1.442695, %v312_v60 }
 0x219   :  { %751 = vpow2.f32 %v492_v61 }
 0x21a   :  { %753 = vpow2.f32 %v491_v62 }
 0x21f   :  { %v748_v63 = vpop.eup %747 }
 0x220   :  { %v750_v0 = vpop.eup %749  ;;  %v333_v1 = vadd.f32 1.0, %v748_v63 }
 0x221   :  { %v332_v2 = vadd.f32 1.0, %v750_v0 }
 0x222   :  { %755 = vrcp.f32 %v333_v1 }
 0x223   :  { %v752_v3 = vpop.eup %751  ;;  %757 = vrcp.f32 %v332_v2 }
 0x224   :  { %v754_v4 = vpop.eup %753  ;;  %v335_v5 = vadd.f32 1.0, %v752_v3 }
 0x225   :  { %v334_v6 = vadd.f32 1.0, %v754_v4 }
 0x226   :  { %759 = vrcp.f32 %v335_v5 }
 0x227   :  { %761 = vrcp.f32 %v334_v6 }
 0x22c   :  { %v756_v8 = vpop.eup %755 }
 0x22d   :  { %v758_v9 = vpop.eup %757  ;;  %v345_v11 = vmul.f32 %v756_v8, %v307_v49 }
 0x22e   :  { %v344_v13 = vmul.f32 %v758_v9, %v302_v52 }
 0x22f   :  { %v349_v14 = vmul.f32 %v345_v11, %v199_v10 }
 0x230   :  { %v760_v15 = vpop.eup %759  ;;  %v348_v16 = vmul.f32 %v344_v13, %v194_v12 }
 0x231   :  { %v762_v17 = vpop.eup %761  ;;  %v347_v19 = vmul.f32 %v760_v15, %v317_v57 }
 0x232   :  { %v346_v23 = vmul.f32 %v762_v17, %v312_v60  ;;  %642 = vmatprep.mubr.msk.f32.mxu0 %vm367_vm0, %v348_v16 }
 0x233   :  { %v351_v24 = vmul.f32 %v347_v19, %v209_v18  ;;  %643 = vmatmul.mubr.msk.f32.vlgmr.msra.gmra.mrb[4].mxu0 %vm367_vm0, %v349_v14 }
 0x234   :  { %v350_v25 = vmul.f32 %v346_v23, %v204_v22 }
 0x236   :  { %645 = vmatprep.mubr.msk.f32.mxu1 %vm367_vm0, %v350_v25 }
 0x237   :  { %646 = vmatmul.mubr.msk.f32.vlgmr.msra.gmra.mrb[4].mxu1 %vm367_vm0, %v351_v24 }
 0x306   :  { %v644_v29 = vpop.f32.mrb[4].mxu0 }
 0x307   :  { %v452_v30 = vadd.f32 %v644_v29, %v493_v26  ;;  %v446_v31 = vpop.f32.mrb[5].mxu0 }
 0x308   :  { %v447_v32 = vadd.f32 %v493_v26, %v446_v31 }
 0x309   :  { %466 = vst.msk [vmem:[#allocation2 + $0x8] sm:$0xff] %vm367_vm0, %v452_v30 }
 0x30a   :  { %465 = vst.msk [vmem:[#allocation2] sm:$0xff] %vm367_vm0, %v447_v32  ;;  %v647_v33 = vpop.f32.mrb[4].mxu1 }
 0x30b   :  { %v462_v20 = vadd.f32 %v647_v33, %v493_v26  ;;  %v456_v34 = vpop.f32.mrb[5].mxu1 }
 0x30c   :  { %v457_v35 = vadd.f32 %v493_v26, %v456_v34 }
 0x30d   :  { %468 = vst.msk [vmem:[#allocation2 + $0x18] sm:$0xff] %vm367_vm0, %v462_v20 }
 0x30e   :  { %467 = vst.msk [vmem:[#allocation2 + $0x10] sm:$0xff] %vm367_vm0, %v457_v35 }
 0x30f   :  { %774 = shalt.err (!%p771_p4)
}
 0x310   :  { %s775_s5 = scalar_lea.hbm %s1036_s9, 512 }
 0x311   :  { %p776_p5 = scmp.ne.s32.totalorder %s1036_s9, %s775_s5  ;;  %p779_p6 = scmp.lt.u32.totalorder %s775_s5, %s1036_s9 }
 0x313   :  { %p781_p7 = pnand %p779_p6, %p776_p5 }
 0x315   :  { %784 = shalt.err (!%p781_p7)
}
 0x316   :  { %s788_s17 = smov 128   ;;  %s789_s18 = smov 8  }
 0x317   :  { %480 = dma.vmem_to_hbm [thread:$0]  %s475_s13, 512, %s1036_s9, [#allocation3], %s788_s17, %s788_s17, %s789_s18  }
 0x318   :  { %785 = dma.done.wait [#allocation3], 512  }
 0x319   :  { %786 = vsyncadd [#allocation3], 4294966784 }
 0x31a   :  { %484 = vsyncpa [#allocation3], 1 }

</bundles_post_ra>
